<compile_context>
chip_gen: v7x
topology: tpu7x:2x2x1
jax: 0.10.0
libtpu: 0.0.40
codegen_flags: <defaults>
</compile_context>

<pallas_src>
import functools

import jax
import jax.numpy as jnp
from jax import lax
from jax.experimental import pallas as pl
from jax.experimental.pallas import tpu as pltpu

ALPHA = 1.0
GAMMA = 2  # focal exponent (applied as an explicit square below)


def _focal_ce_partial_kernel(logits_ref, targets_ref, out_ref, *,
                             tile_n, c_pad, tiles_per_part, n_rows):
    """Accumulate the sum of per-row cross-entropy for one partition."""
    p = pl.program_id(0)   # parallel partition
    i = pl.program_id(1)   # reduction step within the partition

    @pl.when(i == 0)
    def _():
        out_ref[...] = jnp.zeros_like(out_ref)

    x = logits_ref[...].astype(jnp.float32)        # (tile_n, c_pad)
    tgt = targets_ref[...]                         # (tile_n, 1) int32

    # Numerically stable log-softmax cross entropy, one row per sample.
    row_max = jnp.max(x, axis=-1, keepdims=True)                      # (tile_n, 1)
    shifted = x - row_max                                             # (tile_n, c_pad)
    lse = jnp.log(jnp.sum(jnp.exp(shifted), axis=-1, keepdims=True))  # (tile_n, 1)

    # Gather the target-class (shifted) logit with a where-mask.
    class_ids = lax.broadcasted_iota(jnp.int32, (tile_n, c_pad), 1)
    tgt_shifted = jnp.sum(jnp.where(class_ids == tgt, shifted, 0.0),
                          axis=-1, keepdims=True)                     # (tile_n, 1)

    per_row_ce = lse - tgt_shifted                                    # (tile_n, 1)

    # Mask padded rows (ragged last tile / padding-only tail tiles).
    row0 = (p * tiles_per_part + i) * tile_n
    global_row = row0 + lax.broadcasted_iota(jnp.int32, (tile_n, 1), 0)
    per_row_ce = jnp.where(global_row < n_rows, per_row_ce, 0.0)

    # Lane-dense accumulate: every lane of the (1, 128) block holds the sum.
    out_ref[...] += jnp.sum(per_row_ce, keepdims=True)


def focal_loss(logits, targets, *, alpha=ALPHA, gamma=GAMMA,
               num_partitions=2, tile_n=None):
    """logits: (N, C) float, targets: (N,) int -> scalar float32 focal loss."""
    n, c = logits.shape
    assert n >= 1 and c >= 1

    # Lane-dense class dimension (pad C up to a multiple of 128).
    c_pad = pl.cdiv(c, 128) * 128

    # Rows per tile: keep one input buffer <= ~4 MiB (x2 double buffering),
    # a multiple of 8 for sublane alignment, and no bigger than needed.
    itemsize = jnp.dtype(logits.dtype).itemsize
    if tile_n is None:
        rows_budget = (4 * 1024 * 1024) // (itemsize * c_pad)
        tile_n = max(8, min(2048, (rows_budget // 8) * 8))
        tile_n = min(tile_n, pl.cdiv(n, 8) * 8)
    assert tile_n % 8 == 0

    n_tiles = pl.cdiv(n, tile_n)
    p_parts = max(1, min(num_partitions, n_tiles))
    tiles_per_part = pl.cdiv(n_tiles, p_parts)
    n_pad = p_parts * tiles_per_part * tile_n

    # Large negative fill representable in the input dtype: padded class
    # columns never win the row max and exp(shifted) underflows to 0.
    if jnp.issubdtype(logits.dtype, jnp.floating):
        neg_fill = float(jnp.finfo(logits.dtype).min) / 2.0
    else:
        logits = logits.astype(jnp.float32)
        neg_fill = float(jnp.finfo(jnp.float32).min) / 2.0

    logits_p = jnp.pad(logits,
                       ((0, n_pad - n), (0, c_pad - c)),
                       constant_values=neg_fill)
    targets_p = jnp.pad(targets.astype(jnp.int32),
                        (0, n_pad - n)).reshape(n_pad, 1)

    kernel = functools.partial(
        _focal_ce_partial_kernel,
        tile_n=tile_n, c_pad=c_pad,
        tiles_per_part=tiles_per_part, n_rows=n)

    partial = pl.pallas_call(
        kernel,
        out_shape=jax.ShapeDtypeStruct((1, 128 * p_parts), jnp.float32),
        grid_spec=pltpu.PrefetchScalarGridSpec(
            num_scalar_prefetch=0,
            grid=(p_parts, tiles_per_part),
            in_specs=[
                pl.BlockSpec((tile_n, c_pad),
                             lambda p, i: (p * tiles_per_part + i, 0)),
                pl.BlockSpec((tile_n, 1),
                             lambda p, i: (p * tiles_per_part + i, 0)),
            ],
            out_specs=pl.BlockSpec((1, 128), lambda p, i: (0, p)),
        ),
        compiler_params=pltpu.CompilerParams(
            dimension_semantics=("parallel", "arbitrary"),
            vmem_limit_bytes=32 * 1024 * 1024,
        ),
        cost_estimate=pl.CostEstimate(
            flops=5 * n_pad * c_pad,
            transcendentals=n_pad * c_pad,
            bytes_accessed=itemsize * n_pad * c_pad + 4 * n_pad
            + 4 * 128 * p_parts,
        ),
    )(logits_p, targets_p)

    # Tiny scalar epilogue in plain JAX: mean CE + focal transform.
    partial_sums = partial.reshape(p_parts, 128)[:, 0]
    bce = jnp.sum(partial_sums) / jnp.float32(n)
    pt = jnp.exp(-bce)
    one_minus_pt = 1.0 - pt
    if gamma == 2:
        focal_factor = one_minus_pt * one_minus_pt   # explicit square, no pow
    else:
        focal_factor = one_minus_pt ** gamma
    return alpha * focal_factor * bce


def focal_loss_ref(logits, targets, alpha=ALPHA, gamma=GAMMA):
    """Pure-JAX reference mirroring the PyTorch module."""
    log_probs = jax.nn.log_softmax(logits.astype(jnp.float32), axis=-1)
    nll = -jnp.take_along_axis(
        log_probs, targets[:, None].astype(jnp.int32), axis=-1)[:, 0]
    bce = jnp.mean(nll)
    pt = jnp.exp(-bce)
    return alpha * (1.0 - pt) ** gamma * bce


if __name__ == "__main__":
    key = jax.random.PRNGKey(0)
    k_logits, k_targets = jax.random.split(key)

    # Small shapes consistent with the edge-classifier use: N samples, C classes.
    N, C = 8, 16
    logits = jax.random.normal(k_logits, (N, C), dtype=jnp.float32)
    targets = jax.random.randint(k_targets, (N,), 0, C, dtype=jnp.int32)

    loss = jax.block_until_ready(focal_loss(logits, targets))
    ref = focal_loss_ref(logits, targets)
    assert jnp.allclose(loss, ref, rtol=1e-5, atol=1e-6), (loss, ref)

    # Ragged / multi-tile / two-partition sanity check (still small).
    N2, C2 = 37, 10
    l2 = jax.random.normal(jax.random.PRNGKey(1), (N2, C2), dtype=jnp.float32)
    t2 = jax.random.randint(jax.random.PRNGKey(2), (N2,), 0, C2, dtype=jnp.int32)
    loss2 = jax.block_until_ready(focal_loss(l2, t2, tile_n=8))
    ref2 = focal_loss_ref(l2, t2)
    assert jnp.allclose(loss2, ref2, rtol=1e-5, atol=1e-6), (loss2, ref2)

    # Larger ragged case exercising several reduction steps per partition.
    N3, C3 = 300, 7
    l3 = jax.random.normal(jax.random.PRNGKey(3), (N3, C3), dtype=jnp.float32)
    t3 = jax.random.randint(jax.random.PRNGKey(4), (N3,), 0, C3, dtype=jnp.int32)
    loss3 = jax.block_until_ready(focal_loss(l3, t3, tile_n=64))
    ref3 = focal_loss_ref(l3, t3)
    assert jnp.allclose(loss3, ref3, rtol=1e-5, atol=1e-6), (loss3, ref3)

    print("KERNEL_OK")
</pallas_src>

<mosaic_0001>
module attributes {stable_mosaic.version = 11 : i64} {
  func.func @_focal_ce_partial_kernel(%arg0: i32, %arg1: i32, %arg2: memref<8x128xf32, #tpu.memory_space<vmem>>, %arg3: memref<8x1xi32, #tpu.memory_space<vmem>>, %arg4: memref<1x128xf32, #tpu.memory_space<vmem>>) attributes {dimension_semantics = [#tpu.dimension_semantics<parallel>, #tpu.dimension_semantics<arbitrary>], iteration_bounds = array<i64: 1, 1>, scalar_prefetch = 0 : i64, scratch_operands = 0 : i64, tpu.core_type = #tpu.core_type<tc>, window_params = [{transform_indices = @transform_0, window_bounds = array<i64: 8, 128>}, {transform_indices = @transform_1, window_bounds = array<i64: 8, 1>}, {transform_indices = @transform_2, window_bounds = array<i64: 1, 128>}]} {
    %c0_i32 = arith.constant 0 : i32
    %0 = arith.cmpi eq, %arg1, %c0_i32 : i32
    %1 = arith.extui %0 : i1 to i32
    %c0_i32_0 = arith.constant 0 : i32
    %2 = arith.cmpi ne, %1, %c0_i32_0 : i32
    scf.if %2 {
      %cst_14 = arith.constant 0.000000e+00 : f32
      %40 = vector.broadcast %cst_14 : f32 to vector<1x128xf32>
      %c0_15 = arith.constant 0 : index
      %c0_16 = arith.constant 0 : index
      %41 = vector.load %arg4[%c0_15, %c0_16] : memref<1x128xf32, #tpu.memory_space<vmem>>, vector<1x128xf32>
      tpu.vector_store %arg4[%c0_15, %c0_16], %40 {strides = array<i32>} : memref<1x128xf32, #tpu.memory_space<vmem>>, vector<1x128xf32>,
    } else {
    }
    %c0 = arith.constant 0 : index
    %c0_1 = arith.constant 0 : index
    %3 = vector.load %arg2[%c0, %c0_1] : memref<8x128xf32, #tpu.memory_space<vmem>>, vector<8x128xf32>
    %c0_2 = arith.constant 0 : index
    %c0_3 = arith.constant 0 : index
    %4 = vector.load %arg3[%c0_2, %c0_3] : memref<8x1xi32, #tpu.memory_space<vmem>>, vector<8x1xi32>
    %cst = arith.constant dense<0xFF800000> : vector<8xf32>
    %5 = vector.multi_reduction <maximumf>, %3, %cst [1] : vector<8x128xf32> to vector<8xf32>
    %6 = vector.shape_cast %5 : vector<8xf32> to vector<8x1xf32>
    %7 = vector.broadcast %6 : vector<8x1xf32> to vector<8x128xf32>
    %8 = arith.subf %3, %7 : vector<8x128xf32>
    %9 = math.exp %8 : vector<8x128xf32>
    %cst_4 = arith.constant dense<0.000000e+00> : vector<8xf32>
    %10 = vector.multi_reduction <add>, %9, %cst_4 [1] : vector<8x128xf32> to vector<8xf32>
    %11 = vector.shape_cast %10 : vector<8xf32> to vector<8x1xf32>
    %12 = math.log %11 : vector<8x1xf32>
    %13 = tpu.iota {dimensions = array<i32: 1>} : vector<8x128xi32>
    %14 = vector.broadcast %4 : vector<8x1xi32> to vector<8x128xi32>
    %15 = arith.cmpi eq, %13, %14 : vector<8x128xi32>
    %cst_5 = arith.constant 0.000000e+00 : f32
    %16 = vector.broadcast %cst_5 : f32 to vector<8x128xf32>
    %17 = arith.select %15, %8, %16 : vector<8x128xi1>, vector<8x128xf32>
    %cst_6 = arith.constant dense<0.000000e+00> : vector<8xf32>
    %18 = vector.multi_reduction <add>, %17, %cst_6 [1] : vector<8x128xf32> to vector<8xf32>
    %19 = vector.shape_cast %18 : vector<8xf32> to vector<8x1xf32>
    %20 = arith.subf %12, %19 : vector<8x1xf32>
    %c1_i32 = arith.constant 1 : i32
    %21 = arith.muli %arg0, %c1_i32 : i32
    %22 = arith.addi %21, %arg1 : i32
    %c8_i32 = arith.constant 8 : i32
    %23 = arith.muli %22, %c8_i32 : i32
    %24 = tpu.iota {dimensions = array<i32: 0>} : vector<8x1xi32>
    %25 = vector.broadcast %23 : i32 to vector<8x1xi32>
    %26 = arith.addi %25, %24 : vector<8x1xi32>
    %c8_i32_7 = arith.constant 8 : i32
    %27 = vector.broadcast %c8_i32_7 : i32 to vector<8x1xi32>
    %28 = arith.cmpi slt, %26, %27 : vector<8x1xi32>
    %cst_8 = arith.constant 0.000000e+00 : f32
    %29 = vector.broadcast %cst_8 : f32 to vector<8x1xf32>
    %30 = arith.select %28, %20, %29 : vector<8x1xi1>, vector<8x1xf32>
    %c0_9 = arith.constant 0 : index
    %c0_10 = arith.constant 0 : index
    %31 = vector.load %arg4[%c0_9, %c0_10] : memref<1x128xf32, #tpu.memory_space<vmem>>, vector<1x128xf32>
    %32 = vector.shape_cast %30 : vector<8x1xf32> to vector<1x8x1xf32>
    %cst_11 = arith.constant dense<0.000000e+00> : vector<1xf32>
    %33 = vector.multi_reduction <add>, %32, %cst_11 [1, 2] : vector<1x8x1xf32> to vector<1xf32>
    %34 = vector.shape_cast %33 : vector<1xf32> to vector<1x1x1xf32>
    %35 = vector.extract %34[0, 0, 0] : f32 from vector<1x1x1xf32>
    %36 = vector.broadcast %35 : f32 to vector<1x1xf32>
    %37 = vector.broadcast %36 : vector<1x1xf32> to vector<1x128xf32>
    %38 = arith.addf %31, %37 : vector<1x128xf32>
    %c0_12 = arith.constant 0 : index
    %c0_13 = arith.constant 0 : index
    %39 = vector.load %arg4[%c0_12, %c0_13] : memref<1x128xf32, #tpu.memory_space<vmem>>, vector<1x128xf32>
    tpu.vector_store %arg4[%c0_12, %c0_13], %38 {strides = array<i32>} : memref<1x128xf32, #tpu.memory_space<vmem>>, vector<1x128xf32>,
    return
  }
  func.func @transform_0(%arg0: i32, %arg1: i32) -> (i32, i32) {
    %c1_i32 = arith.constant 1 : i32
    %0 = arith.muli %arg0, %c1_i32 : i32
    %1 = arith.addi %0, %arg1 : i32
    %c0_i32 = arith.constant 0 : i32
    %c0_i32_0 = arith.constant 0 : i32
    return %1, %c0_i32 : i32, i32
  }
  func.func @transform_1(%arg0: i32, %arg1: i32) -> (i32, i32) {
    %c1_i32 = arith.constant 1 : i32
    %0 = arith.muli %arg0, %c1_i32 : i32
    %1 = arith.addi %0, %arg1 : i32
    %c0_i32 = arith.constant 0 : i32
    %c0_i32_0 = arith.constant 0 : i32
    return %1, %c0_i32 : i32, i32
  }
  func.func @transform_2(%arg0: i32, %arg1: i32) -> (i32, i32) {
    %c0_i32 = arith.constant 0 : i32
    %c0_i32_0 = arith.constant 0 : i32
    return %c0_i32, %arg0 : i32, i32
  }
}

</mosaic_0001>

<bundles_post_ra>
// kernel: tpu_custom_call.1
= control target key start
LH: loop header
LB: loop body
LE: loop exit
PB: predicated region body
PF: predicated region fallthrough
CT: control target
= control target key end

     0   :  { %s191_s0 = inlined_call_operand.vmem [shape: f32[8,128], index: 0, kind: input, shape index: {}]   ;;  %s192_s1 = inlined_call_operand.vmem [shape: s32[8,1], index: 1, kind: input, shape index: {}]   ;;  %s193_s2 = inlined_call_operand.hbm [shape: f32[1,128], index: 2, kind: output, shape index: {}]  }
   0x1   :  { %v51_v0 = vld [vmem:[%s191_s0] sm:$0xff] }
   0x2   :  { %7 = vsyncpa [#allocation3], 0  ;;  %53 = vmax.xlane.f32.xlu0 %v51_v0  ;;  %v155_v1 = vmov 0   ;;  %v52_v2 = vld [vmem:[%s192_s1] sm:$0xff]  ;;  %v62_v6 = vlaneseq  ;;  %vm81_vm1 = vcmask 7168   ;;  %v156_v17 = vmov 0.0  }
   0x3   :  { %126 = vset.pattern.permute.xlu0 %v155_v1  ;;  %50 = vst [vmem:[#allocation2] sm:$0x1] %v156_v17  ;;  %s157_s0 = smov [#allocation2]  }
   0x4   :  { %v63_v7 = vand.u32 127, %v62_v6  ;;  %s101_s1 = sshll.u32 %s157_s0, 4  ;;  %s102_s1 = int_to_ptr.vmem [resolvable:$true] %s101_s1 }
   0x5   :  { %s131_s14 = scalar_lea.vmem %s102_s1, 16  ;;  %s135_s15 = scalar_lea.vmem %s102_s1, 32 }
   0x6   :  { %p132_p0 = scmp.ne.s32.totalorder %s102_s1, %s131_s14  ;;  %p136_p1 = scmp.lt.s32.totalorder %s102_s1, %s102_s1 }
   0x7   :  { %p137_p2 = scmp.lt.s32.totalorder %s135_s15, %s131_s14 }
   0x9   :  { %p138_p3 = por %p137_p2, %p136_p1 }
   0xa   :  { %v80_v25 = vld [vmem:[#allocation2] sm:$0x1] }
   0xb   :  { %p139_p4 = pnand %p138_p3, %p132_p0 }
  0x18   :  { %65 = vperm.xlu0 %126, %v52_v2  }
  0x8f   :  { %v54_v3 = vpop.xlane.xlu0 %53 }
  0x90   :  { %v55_v4 = vsub.f32 %v51_v0, %v54_v3 }
  0x92   :  { %v56_v5 = vmul.f32 1.442695, %v55_v4 }
  0x94   :  { %127 = vpow2.f32 %v56_v5 }
  0x97   :  { %v66_v8 = vpop.permute.xlu0 %65 }
  0x98   :  { %vm67_vm0 = vcmp.eq.s32.totalorder %v63_v7, %v66_v8 }
  0x99   :  { %v68_v10 = vsel %vm67_vm0, %v55_v4, 0.0 }
  0x9e   :  { %v128_v9 = vpop.eup %127 }
  0x9f   :  { %58 = vadd.xlane.f32.xlu1 %v128_v9 }
  0xa3   :  { %69 = vadd.xlane.f32.xlu1 %v68_v10 }
 0x12c   :  { %v59_v11 = vpop.xlane.xlu1 %58 }
 0x12d   :  { %129 = vlog2.f32 %v59_v11 }
 0x130   :  { %v70_v14 = vpop.xlane.xlu1 %69 }
 0x137   :  { %v130_v12 = vpop.eup %129 }
 0x138   :  { %v61_v13 = vmul.f32 0.6931472, %v130_v12 }
 0x13a   :  { %v71_v15 = vsub.f32 %v61_v13, %v70_v14 }
 0x13c   :  { %v82_v16 = vsel %vm81_vm1, %v71_v15, 0.0 }
 0x13d   :  { %83 = vadd.xlane.f32.xlu1 %v82_v16 }
 0x1ca   :  { %v84_v18 = vpop.xlane.xlu1 %83 }
 0x1cb   :  { %v85_v19 = vrot.slane %v84_v18, 4 }
 0x1cd   :  { %v86_v20 = vadd.f32 %v85_v19, %v84_v18 }
 0x1cf   :  { %v87_v21 = vrot.slane %v86_v20, 2 }
 0x1d1   :  { %v88_v22 = vadd.f32 %v87_v21, %v86_v20 }
 0x1d3   :  { %v89_v23 = vrot.slane %v88_v22, 1 }
 0x1d5   :  { %v90_v24 = vadd.f32 %v89_v23, %v88_v22 }
 0x1d7   :  { %121 = vpush %v90_v24 }
 0x208   :  { %s122_s13 = spop %121 }
 0x209   :  { %v92_v26 = vstv %s122_s13 }
 0x20a   :  { %v93_v27 = vadd.f32 %v92_v26, %v80_v25 }
 0x20c   :  { %94 = vst [vmem:[#allocation2] sm:$0x1] %v93_v27 }
 0x20d   :  { %142 = shalt.err (!%p139_p4)
}
 0x20e   :  { %s143_s18 = scalar_lea.hbm %s193_s2, 16 }
 0x20f   :  { %p144_p5 = scmp.ne.s32.totalorder %s193_s2, %s143_s18  ;;  %p147_p6 = scmp.lt.u32.totalorder %s143_s18, %s193_s2 }
 0x211   :  { %p149_p7 = pnand %p147_p6, %p144_p5 }
 0x213   :  { %152 = shalt.err (!%p149_p7)
}
 0x214   :  { %104 = dma.vmem_to_hbm [thread:$0]  %s102_s1, 16, %s193_s2, [#allocation3]  }
 0x215   :  { %153 = dma.done.wait [#allocation3], 16  }
 0x216   :  { %154 = vsyncadd [#allocation3], 4294967280 }
 0x217   :  { %108 = vsyncpa [#allocation3], 1 }

</bundles_post_ra>
